<compile_context>
chip_gen: v7x
topology: tpu7x:2x2x1
jax: 0.10.0
libtpu: 0.0.40
codegen_flags: <defaults>
</compile_context>

<pallas_src>
import functools

import jax
import jax.numpy as jnp
from jax import lax
from jax.experimental import pallas as pl
from jax.experimental.pallas import tpu as pltpu

NEG_SLOPE = 0.01      # F.leaky_relu default
GN_EPS = 1e-5         # nn.GroupNorm default eps


def _leaky(v):
    # identical to leaky_relu for slope in (0, 1); single vmax on the VPU
    return jnp.maximum(v, NEG_SLOPE * v)


def _encoder_kernel(x_ref, ex_ref, w1_ref, b1_ref, slope_ref, w2_ref, b2_ref,
                    gsc_ref, gt_ref, gamma_ref, beta_ref, out_ref,
                    *, C, TB, parent_width, symmetric_type):
    """One batch tile.  x_ref: (1, C*TB, Fin_cat) child-major; ex_ref: (1, C*TB, 1)."""
    x = x_ref[0]                                    # (C*TB, Fin_cat)
    ex = ex_ref[0]                                  # (C*TB, 1)

    # fused first layer: columns = [child_s (H) | child_g (H) | skip_s (Fs) | skip_g (Fg)]
    h = jnp.dot(x, w1_ref[...], preferred_element_type=jnp.float32) + b1_ref[...]
    h = jnp.maximum(h, slope_ref[...] * h)          # leaky on child cols, identity on skip cols
    h = h * ex                                      # mask by child existence

    # pool over children: contiguous, sublane-aligned (TB, N) blocks
    acc = h[0:TB, :]
    for c in range(1, C):                           # static unrolled, C is small
        blk = h[c * TB:(c + 1) * TB, :]
        acc = jnp.maximum(acc, blk) if symmetric_type == "max" else acc + blk
    if symmetric_type == "avg":
        den = ex[0:TB, :]
        for c in range(1, C):
            den = den + ex[c * TB:(c + 1) * TB, :]
        acc = acc / den

    pooled = _leaky(acc)                            # (TB, 2H + Fs + Fg)
    parent = pooled[:, :parent_width]               # (TB, 2H) — lane 0 aligned
    skip = pooled[:, parent_width:]                 # (TB, Fs + Fg)

    # fused second layer (block-diagonal): (TB, 2H) @ (2H, Fs+Fg)
    y = jnp.dot(parent, w2_ref[...], preferred_element_type=jnp.float32) + b2_ref[...]

    # GroupNorm of both branches via grouping matmuls (no lane-splitting reshape):
    #   Gsc: (F, ng_total) one-hot / group_size ; Gt: (ng_total, F) one-hot
    mean = jnp.dot(jnp.dot(y, gsc_ref[...], preferred_element_type=jnp.float32),
                   gt_ref[...], preferred_element_type=jnp.float32)
    d = y - mean
    var = jnp.dot(jnp.dot(d * d, gsc_ref[...], preferred_element_type=jnp.float32),
                  gt_ref[...], preferred_element_type=jnp.float32)
    y_norm = d * lax.rsqrt(var + GN_EPS) * gamma_ref[...] + beta_ref[...]

    out_ref[...] = _leaky(skip + y_norm)            # (TB, Fs + Fg)


def symmetric_child_encoder_forward(child_feats, child_geo_feats, child_exists, p,
                                    symmetric_type="max", batch_tile=None):
    """child_feats: (B, C, Fin_s) f32; child_geo_feats: (B, C, Fg); child_exists: (B, C, 1)."""
    assert symmetric_type in ("max", "sum", "avg")
    f32 = jnp.float32
    B, C, Fin_s = child_feats.shape
    Fg = child_geo_feats.shape[2]
    H, Fs = p["w2_s"].shape
    assert p["w2_g"].shape == (H, Fg)

    TB = B if batch_tile is None else min(batch_tile, B)
    assert B % TB == 0, "batch must be divisible by the batch tile"
    n_tiles = B // TB

    Fin_cat = Fin_s + Fg
    parent_width = 2 * H
    skip_width = Fs + Fg
    N = parent_width + skip_width

    # --- wrapper-side data rearrangement (plain XLA, outside the kernel) ---------------
    # concatenate struct/geo inputs along features, rearrange to child-major per tile
    x_cat = jnp.concatenate([child_feats.astype(f32), child_geo_feats.astype(f32)], axis=-1)
    x_t = (x_cat.reshape(n_tiles, TB, C, Fin_cat)
                .transpose(0, 2, 1, 3)
                .reshape(n_tiles, C * TB, Fin_cat))
    ex_t = (child_exists.astype(f32).reshape(n_tiles, TB, C, 1)
                        .transpose(0, 2, 1, 3)
                        .reshape(n_tiles, C * TB, 1))

    # fused block-diagonal first layer: columns = [child_s | child_g | skip_s | skip_g]
    W1 = jnp.zeros((Fin_cat, N), f32)
    W1 = W1.at[:Fin_s, 0:H].set(p["w_child_s"])
    W1 = W1.at[Fin_s:, H:2 * H].set(p["w_child_g"])
    W1 = W1.at[:Fin_s, 2 * H:2 * H + Fs].set(p["w_skip_s"])
    W1 = W1.at[Fin_s:, 2 * H + Fs:].set(p["w_skip_g"])
    b1 = jnp.concatenate([p["b_child_s"], p["b_child_g"], p["b_skip_s"], p["b_skip_g"]], axis=1)
    slope = jnp.concatenate([jnp.full((1, parent_width), NEG_SLOPE, f32),
                             jnp.ones((1, skip_width), f32)], axis=1)

    # fused block-diagonal second layer: (2H, Fs+Fg)
    W2 = jnp.zeros((parent_width, skip_width), f32)
    W2 = W2.at[:H, :Fs].set(p["w2_s"])
    W2 = W2.at[H:, Fs:].set(p["w2_g"])
    b2 = jnp.concatenate([p["b2_s"], p["b2_g"]], axis=1)
    gamma = jnp.concatenate([p["gamma_s"], p["gamma_g"]], axis=1)
    beta = jnp.concatenate([p["beta_s"], p["beta_g"]], axis=1)

    # GroupNorm grouping matrices (block-diagonal over the two branches)
    ng_s = min(32, Fs // 8)
    ng_g = min(32, Fg // 8)
    gsz_s, gsz_g = Fs // ng_s, Fg // ng_g
    ch = jnp.arange(skip_width)
    grp = jnp.where(ch < Fs, ch // gsz_s, ng_s + (ch - Fs) // gsz_g)            # (F,)
    onehot = (grp[:, None] == jnp.arange(ng_s + ng_g)[None, :]).astype(f32)     # (F, ng)
    inv_size = jnp.where(jnp.arange(ng_s + ng_g) < ng_s, 1.0 / gsz_s, 1.0 / gsz_g).astype(f32)
    Gsc = onehot * inv_size[None, :]                                            # (F, ng)
    Gt = onehot.T                                                               # (ng, F)

    # --- pallas call --------------------------------------------------------------------
    kernel = functools.partial(_encoder_kernel, C=C, TB=TB,
                               parent_width=parent_width, symmetric_type=symmetric_type)

    def const_spec(a):
        nd = a.ndim
        return pl.BlockSpec(tuple(a.shape), lambda i, _nd=nd: (0,) * _nd)

    out = pl.pallas_call(
        kernel,
        out_shape=jax.ShapeDtypeStruct((B, skip_width), f32),
        grid=(n_tiles,),
        in_specs=[
            pl.BlockSpec((1, C * TB, Fin_cat), lambda i: (i, 0, 0)),   # x (child-major tile)
            pl.BlockSpec((1, C * TB, 1), lambda i: (i, 0, 0)),         # child_exists
            const_spec(W1), const_spec(b1), const_spec(slope),
            const_spec(W2), const_spec(b2),
            const_spec(Gsc), const_spec(Gt),
            const_spec(gamma), const_spec(beta),
        ],
        out_specs=pl.BlockSpec((TB, skip_width), lambda i: (i, 0)),
        compiler_params=pltpu.CompilerParams(
            dimension_semantics=("parallel",)),       # batch tiles shard across TCs (v7x)
    )(x_t, ex_t, W1, b1, slope, W2, b2, Gsc, Gt, gamma, beta)

    return out[:, :Fs], out[:, Fs:]


# ------------------------- pure-JAX reference (PyTorch semantics) -------------------------

def _reference_forward(child_feats, child_geo_feats, child_exists, p, symmetric_type):
    P = lax.Precision.HIGHEST
    lrelu = lambda v: jnp.where(v > 0, v, NEG_SLOPE * v)

    def branch(x, w_skip, b_skip, w_child, b_child, w2, b2, gamma, beta, feat_size):
        skip = jnp.dot(x, w_skip, precision=P) + b_skip                    # (B, C, F)
        child = lrelu(jnp.dot(x, w_child, precision=P) + b_child)          # (B, C, H)
        child = child * child_exists
        skip = skip * child_exists
        if symmetric_type == "max":
            parent = lrelu(child.max(axis=1))
            skipf = lrelu(skip.max(axis=1))
        elif symmetric_type == "sum":
            parent = lrelu(child.sum(axis=1))
            skipf = lrelu(skip.sum(axis=1))
        else:  # avg
            denom = child_exists.sum(axis=1)
            parent = lrelu(child.sum(axis=1) / denom)
            skipf = lrelu(skip.sum(axis=1) / denom)
        y = jnp.dot(parent, w2, precision=P) + b2
        ng = min(32, feat_size // 8)
        Bn = y.shape[0]
        yg = y.reshape(Bn, ng, feat_size // ng)
        mean = yg.mean(-1, keepdims=True)
        var = ((yg - mean) ** 2).mean(-1, keepdims=True)
        yn = ((yg - mean) / jnp.sqrt(var + GN_EPS)).reshape(Bn, feat_size) * gamma + beta
        return lrelu(skipf + yn)

    out_s = branch(child_feats, p["w_skip_s"], p["b_skip_s"], p["w_child_s"], p["b_child_s"],
                   p["w2_s"], p["b2_s"], p["gamma_s"], p["beta_s"], p["w2_s"].shape[1])
    out_g = branch(child_geo_feats, p["w_skip_g"], p["b_skip_g"], p["w_child_g"], p["b_child_g"],
                   p["w2_g"], p["b2_g"], p["gamma_g"], p["beta_g"], p["w2_g"].shape[1])
    return out_s, out_g


def _init_linear(key, in_dim, out_dim):
    """PyTorch-style Linear init, weight already transposed to (in, out)."""
    kw, kb = jax.random.split(key)
    bound = 1.0 / jnp.sqrt(in_dim)
    w = jax.random.uniform(kw, (in_dim, out_dim), jnp.float32, -bound, bound)
    b = jax.random.uniform(kb, (1, out_dim), jnp.float32, -bound, bound)
    return w, b


if __name__ == "__main__":
    # small, deterministic shapes consistent with the module
    batch, max_childs = 8, 10
    num_sem, max_part_per_parent = 10, 6
    feature_size_struct, feature_size_geo, hidden_size = 32, 32, 64
    fin_struct = num_sem + max_part_per_parent + feature_size_struct       # 48
    symmetric_type = "max"

    key = jax.random.PRNGKey(0)
    ks = jax.random.split(key, 12)

    child_feats = jax.random.normal(ks[0], (batch, max_childs, fin_struct), jnp.float32)
    child_geo_feats = jax.random.normal(ks[1], (batch, max_childs, feature_size_geo), jnp.float32)
    child_exists = (jax.random.uniform(ks[2], (batch, max_childs, 1)) < 0.7).astype(jnp.float32)
    child_exists = child_exists.at[:, 0, :].set(1.0)   # at least one child per sample

    w_skip_s, b_skip_s = _init_linear(ks[3], fin_struct, feature_size_struct)
    w_child_s, b_child_s = _init_linear(ks[4], fin_struct, hidden_size)
    w2_s, b2_s = _init_linear(ks[5], hidden_size, feature_size_struct)
    w_skip_g, b_skip_g = _init_linear(ks[6], feature_size_geo, feature_size_geo)
    w_child_g, b_child_g = _init_linear(ks[7], feature_size_geo, hidden_size)
    w2_g, b2_g = _init_linear(ks[8], hidden_size, feature_size_geo)
    gamma_s = 1.0 + 0.1 * jax.random.normal(ks[9], (1, feature_size_struct), jnp.float32)
    beta_s = 0.1 * jax.random.normal(ks[10], (1, feature_size_struct), jnp.float32)
    gamma_g = 1.0 + 0.1 * jax.random.normal(ks[11], (1, feature_size_geo), jnp.float32)
    beta_g = 0.1 * jax.random.normal(ks[9], (1, feature_size_geo), jnp.float32)

    params = dict(w_skip_s=w_skip_s, b_skip_s=b_skip_s, w_child_s=w_child_s, b_child_s=b_child_s,
                  w2_s=w2_s, b2_s=b2_s, gamma_s=gamma_s, beta_s=beta_s,
                  w_skip_g=w_skip_g, b_skip_g=b_skip_g, w_child_g=w_child_g, b_child_g=b_child_g,
                  w2_g=w2_g, b2_g=b2_g, gamma_g=gamma_g, beta_g=beta_g)

    out_s, out_g = symmetric_child_encoder_forward(
        child_feats, child_geo_feats, child_exists, params, symmetric_type=symmetric_type)
    out_s, out_g = jax.block_until_ready((out_s, out_g))

    ref_s, ref_g = _reference_forward(child_feats, child_geo_feats, child_exists,
                                      params, symmetric_type)

    assert out_s.shape == (batch, feature_size_struct)
    assert out_g.shape == (batch, feature_size_geo)
    assert jnp.allclose(out_s, ref_s, atol=5e-4, rtol=5e-4)
    assert jnp.allclose(out_g, ref_g, atol=5e-4, rtol=5e-4)

    print("KERNEL_OK")
</pallas_src>

<mosaic_0001>
module attributes {stable_mosaic.version = 11 : i64} {
  func.func @_encoder_kernel(%arg0: i32, %arg1: memref<1x80x80xf32, #tpu.memory_space<vmem>>, %arg2: memref<1x80x1xf32, #tpu.memory_space<vmem>>, %arg3: memref<80x192xf32, #tpu.memory_space<vmem>>, %arg4: memref<1x192xf32, #tpu.memory_space<vmem>>, %arg5: memref<1x192xf32, #tpu.memory_space<vmem>>, %arg6: memref<128x64xf32, #tpu.memory_space<vmem>>, %arg7: memref<1x64xf32, #tpu.memory_space<vmem>>, %arg8: memref<64x8xf32, #tpu.memory_space<vmem>>, %arg9: memref<8x64xf32, #tpu.memory_space<vmem>>, %arg10: memref<1x64xf32, #tpu.memory_space<vmem>>, %arg11: memref<1x64xf32, #tpu.memory_space<vmem>>, %arg12: memref<8x64xf32, #tpu.memory_space<vmem>>) attributes {dimension_semantics = [#tpu.dimension_semantics<parallel>], iteration_bounds = array<i64: 1>, scalar_prefetch = 0 : i64, scratch_operands = 0 : i64, tpu.core_type = #tpu.core_type<tc>, window_params = [{transform_indices = @transform_0, window_bounds = array<i64: 1, 80, 80>}, {transform_indices = @transform_1, window_bounds = array<i64: 1, 80, 1>}, {pipeline_mode = #tpu.pipeline_mode<synchronous>, transform_indices = @transform_2, window_bounds = array<i64: 80, 192>}, {pipeline_mode = #tpu.pipeline_mode<synchronous>, transform_indices = @transform_3, window_bounds = array<i64: 1, 192>}, {pipeline_mode = #tpu.pipeline_mode<synchronous>, transform_indices = @transform_4, window_bounds = array<i64: 1, 192>}, {pipeline_mode = #tpu.pipeline_mode<synchronous>, transform_indices = @transform_5, window_bounds = array<i64: 128, 64>}, {pipeline_mode = #tpu.pipeline_mode<synchronous>, transform_indices = @transform_6, window_bounds = array<i64: 1, 64>}, {pipeline_mode = #tpu.pipeline_mode<synchronous>, transform_indices = @transform_7, window_bounds = array<i64: 64, 8>}, {pipeline_mode = #tpu.pipeline_mode<synchronous>, transform_indices = @transform_8, window_bounds = array<i64: 8, 64>}, {pipeline_mode = #tpu.pipeline_mode<synchronous>, transform_indices = @transform_9, window_bounds = array<i64: 1, 64>}, {pipeline_mode = #tpu.pipeline_mode<synchronous>, transform_indices = @transform_10, window_bounds = array<i64: 1, 64>}, {transform_indices = @transform_11, window_bounds = array<i64: 8, 64>}]} {
    %c0 = arith.constant 0 : index
    %c0_0 = arith.constant 0 : index
    %c0_1 = arith.constant 0 : index
    %0 = vector.load %arg1[%c0, %c0_0, %c0_1] : memref<1x80x80xf32, #tpu.memory_space<vmem>>, vector<1x80x80xf32>
    %1 = vector.shape_cast %0 : vector<1x80x80xf32> to vector<80x80xf32>
    %c0_2 = arith.constant 0 : index
    %c0_3 = arith.constant 0 : index
    %c0_4 = arith.constant 0 : index
    %2 = vector.load %arg2[%c0_2, %c0_3, %c0_4] : memref<1x80x1xf32, #tpu.memory_space<vmem>>, vector<1x80x1xf32>
    %3 = vector.shape_cast %2 : vector<1x80x1xf32> to vector<80x1xf32>
    %c0_5 = arith.constant 0 : index
    %c0_6 = arith.constant 0 : index
    %4 = vector.load %arg3[%c0_5, %c0_6] : memref<80x192xf32, #tpu.memory_space<vmem>>, vector<80x192xf32>
    %cst = arith.constant dense<0.000000e+00> : vector<80x192xf32>
    %5 = tpu.matmul %1, %4, %cst {dimension_numbers = #tpu.dot_dimension_numbers<[1], [0], [0], [1], [0, 0, 1, 1], [], []>} : vector<80x80xf32>, vector<80x192xf32>, vector<80x192xf32> -> vector<80x192xf32>
    %c0_7 = arith.constant 0 : index
    %c0_8 = arith.constant 0 : index
    %6 = vector.load %arg4[%c0_7, %c0_8] : memref<1x192xf32, #tpu.memory_space<vmem>>, vector<1x192xf32>
    %7 = vector.broadcast %6 : vector<1x192xf32> to vector<80x192xf32>
    %8 = arith.addf %5, %7 : vector<80x192xf32>
    %c0_9 = arith.constant 0 : index
    %c0_10 = arith.constant 0 : index
    %9 = vector.load %arg5[%c0_9, %c0_10] : memref<1x192xf32, #tpu.memory_space<vmem>>, vector<1x192xf32>
    %10 = vector.broadcast %9 : vector<1x192xf32> to vector<80x192xf32>
    %11 = arith.mulf %10, %8 : vector<80x192xf32>
    %12 = arith.maximumf %8, %11 : vector<80x192xf32>
    %13 = vector.broadcast %3 : vector<80x1xf32> to vector<80x192xf32>
    %14 = arith.mulf %12, %13 : vector<80x192xf32>
    %15 = vector.extract_strided_slice %14 {offsets = [0, 0], sizes = [8, 192], strides = [1, 1]} : vector<80x192xf32> to vector<8x192xf32>
    %16 = vector.extract_strided_slice %14 {offsets = [8, 0], sizes = [8, 192], strides = [1, 1]} : vector<80x192xf32> to vector<8x192xf32>
    %17 = arith.maximumf %15, %16 : vector<8x192xf32>
    %18 = vector.extract_strided_slice %14 {offsets = [16, 0], sizes = [8, 192], strides = [1, 1]} : vector<80x192xf32> to vector<8x192xf32>
    %19 = arith.maximumf %17, %18 : vector<8x192xf32>
    %20 = vector.extract_strided_slice %14 {offsets = [24, 0], sizes = [8, 192], strides = [1, 1]} : vector<80x192xf32> to vector<8x192xf32>
    %21 = arith.maximumf %19, %20 : vector<8x192xf32>
    %22 = vector.extract_strided_slice %14 {offsets = [32, 0], sizes = [8, 192], strides = [1, 1]} : vector<80x192xf32> to vector<8x192xf32>
    %23 = arith.maximumf %21, %22 : vector<8x192xf32>
    %24 = vector.extract_strided_slice %14 {offsets = [40, 0], sizes = [8, 192], strides = [1, 1]} : vector<80x192xf32> to vector<8x192xf32>
    %25 = arith.maximumf %23, %24 : vector<8x192xf32>
    %26 = vector.extract_strided_slice %14 {offsets = [48, 0], sizes = [8, 192], strides = [1, 1]} : vector<80x192xf32> to vector<8x192xf32>
    %27 = arith.maximumf %25, %26 : vector<8x192xf32>
    %28 = vector.extract_strided_slice %14 {offsets = [56, 0], sizes = [8, 192], strides = [1, 1]} : vector<80x192xf32> to vector<8x192xf32>
    %29 = arith.maximumf %27, %28 : vector<8x192xf32>
    %30 = vector.extract_strided_slice %14 {offsets = [64, 0], sizes = [8, 192], strides = [1, 1]} : vector<80x192xf32> to vector<8x192xf32>
    %31 = arith.maximumf %29, %30 : vector<8x192xf32>
    %32 = vector.extract_strided_slice %14 {offsets = [72, 0], sizes = [8, 192], strides = [1, 1]} : vector<80x192xf32> to vector<8x192xf32>
    %33 = arith.maximumf %31, %32 : vector<8x192xf32>
    %cst_11 = arith.constant 0.00999999977 : f32
    %34 = vector.broadcast %cst_11 : f32 to vector<8x192xf32>
    %35 = arith.mulf %34, %33 : vector<8x192xf32>
    %36 = arith.maximumf %33, %35 : vector<8x192xf32>
    %37 = vector.extract_strided_slice %36 {offsets = [0, 0], sizes = [8, 128], strides = [1, 1]} : vector<8x192xf32> to vector<8x128xf32>
    %38 = vector.extract_strided_slice %36 {offsets = [0, 128], sizes = [8, 64], strides = [1, 1]} : vector<8x192xf32> to vector<8x64xf32>
    %c0_12 = arith.constant 0 : index
    %c0_13 = arith.constant 0 : index
    %39 = vector.load %arg6[%c0_12, %c0_13] : memref<128x64xf32, #tpu.memory_space<vmem>>, vector<128x64xf32>
    %cst_14 = arith.constant dense<0.000000e+00> : vector<8x64xf32>
    %40 = tpu.matmul %37, %39, %cst_14 {dimension_numbers = #tpu.dot_dimension_numbers<[1], [0], [0], [1], [0, 0, 1, 1], [], []>} : vector<8x128xf32>, vector<128x64xf32>, vector<8x64xf32> -> vector<8x64xf32>
    %c0_15 = arith.constant 0 : index
    %c0_16 = arith.constant 0 : index
    %41 = vector.load %arg7[%c0_15, %c0_16] : memref<1x64xf32, #tpu.memory_space<vmem>>, vector<1x64xf32>
    %42 = vector.broadcast %41 : vector<1x64xf32> to vector<8x64xf32>
    %43 = arith.addf %40, %42 : vector<8x64xf32>
    %c0_17 = arith.constant 0 : index
    %c0_18 = arith.constant 0 : index
    %44 = vector.load %arg8[%c0_17, %c0_18] : memref<64x8xf32, #tpu.memory_space<vmem>>, vector<64x8xf32>
    %cst_19 = arith.constant dense<0.000000e+00> : vector<8x8xf32>
    %45 = tpu.matmul %43, %44, %cst_19 {dimension_numbers = #tpu.dot_dimension_numbers<[1], [0], [0], [1], [0, 0, 1, 1], [], []>} : vector<8x64xf32>, vector<64x8xf32>, vector<8x8xf32> -> vector<8x8xf32>
    %c0_20 = arith.constant 0 : index
    %c0_21 = arith.constant 0 : index
    %46 = vector.load %arg9[%c0_20, %c0_21] : memref<8x64xf32, #tpu.memory_space<vmem>>, vector<8x64xf32>
    %cst_22 = arith.constant dense<0.000000e+00> : vector<8x64xf32>
    %47 = tpu.matmul %45, %46, %cst_22 {dimension_numbers = #tpu.dot_dimension_numbers<[1], [0], [0], [1], [0, 0, 1, 1], [], []>} : vector<8x8xf32>, vector<8x64xf32>, vector<8x64xf32> -> vector<8x64xf32>
    %48 = arith.subf %43, %47 : vector<8x64xf32>
    %49 = arith.mulf %48, %48 : vector<8x64xf32>
    %c0_23 = arith.constant 0 : index
    %c0_24 = arith.constant 0 : index
    %50 = vector.load %arg8[%c0_23, %c0_24] : memref<64x8xf32, #tpu.memory_space<vmem>>, vector<64x8xf32>
    %cst_25 = arith.constant dense<0.000000e+00> : vector<8x8xf32>
    %51 = tpu.matmul %49, %50, %cst_25 {dimension_numbers = #tpu.dot_dimension_numbers<[1], [0], [0], [1], [0, 0, 1, 1], [], []>} : vector<8x64xf32>, vector<64x8xf32>, vector<8x8xf32> -> vector<8x8xf32>
    %c0_26 = arith.constant 0 : index
    %c0_27 = arith.constant 0 : index
    %52 = vector.load %arg9[%c0_26, %c0_27] : memref<8x64xf32, #tpu.memory_space<vmem>>, vector<8x64xf32>
    %cst_28 = arith.constant dense<0.000000e+00> : vector<8x64xf32>
    %53 = tpu.matmul %51, %52, %cst_28 {dimension_numbers = #tpu.dot_dimension_numbers<[1], [0], [0], [1], [0, 0, 1, 1], [], []>} : vector<8x8xf32>, vector<8x64xf32>, vector<8x64xf32> -> vector<8x64xf32>
    %cst_29 = arith.constant 9.99999974E-6 : f32
    %54 = vector.broadcast %cst_29 : f32 to vector<8x64xf32>
    %55 = arith.addf %53, %54 : vector<8x64xf32>
    %56 = math.rsqrt %55 : vector<8x64xf32>
    %57 = arith.mulf %48, %56 : vector<8x64xf32>
    %c0_30 = arith.constant 0 : index
    %c0_31 = arith.constant 0 : index
    %58 = vector.load %arg10[%c0_30, %c0_31] : memref<1x64xf32, #tpu.memory_space<vmem>>, vector<1x64xf32>
    %59 = vector.broadcast %58 : vector<1x64xf32> to vector<8x64xf32>
    %60 = arith.mulf %57, %59 : vector<8x64xf32>
    %c0_32 = arith.constant 0 : index
    %c0_33 = arith.constant 0 : index
    %61 = vector.load %arg11[%c0_32, %c0_33] : memref<1x64xf32, #tpu.memory_space<vmem>>, vector<1x64xf32>
    %62 = vector.broadcast %61 : vector<1x64xf32> to vector<8x64xf32>
    %63 = arith.addf %60, %62 : vector<8x64xf32>
    %64 = arith.addf %38, %63 : vector<8x64xf32>
    %cst_34 = arith.constant 0.00999999977 : f32
    %65 = vector.broadcast %cst_34 : f32 to vector<8x64xf32>
    %66 = arith.mulf %65, %64 : vector<8x64xf32>
    %67 = arith.maximumf %64, %66 : vector<8x64xf32>
    %c0_35 = arith.constant 0 : index
    %c0_36 = arith.constant 0 : index
    %68 = vector.load %arg12[%c0_35, %c0_36] : memref<8x64xf32, #tpu.memory_space<vmem>>, vector<8x64xf32>
    tpu.vector_store %arg12[%c0_35, %c0_36], %67 {strides = array<i32>} : memref<8x64xf32, #tpu.memory_space<vmem>>, vector<8x64xf32>,
    return
  }
  func.func @transform_0(%arg0: i32) -> (i32, i32, i32) {
    %c0_i32 = arith.constant 0 : i32
    %c0_i32_0 = arith.constant 0 : i32
    %c0_i32_1 = arith.constant 0 : i32
    return %arg0, %c0_i32, %c0_i32_0 : i32, i32, i32
  }
  func.func @transform_1(%arg0: i32) -> (i32, i32, i32) {
    %c0_i32 = arith.constant 0 : i32
    %c0_i32_0 = arith.constant 0 : i32
    %c0_i32_1 = arith.constant 0 : i32
    return %arg0, %c0_i32, %c0_i32_0 : i32, i32, i32
  }
  func.func @transform_2(%arg0: i32) -> (i32, i32) {
    %c0_i32 = arith.constant 0 : i32
    %c0_i32_0 = arith.constant 0 : i32
    %c0_i32_1 = arith.constant 0 : i32
    return %c0_i32, %c0_i32_0 : i32, i32
  }
  func.func @transform_3(%arg0: i32) -> (i32, i32) {
    %c0_i32 = arith.constant 0 : i32
    %c0_i32_0 = arith.constant 0 : i32
    %c0_i32_1 = arith.constant 0 : i32
    return %c0_i32, %c0_i32_0 : i32, i32
  }
  func.func @transform_4(%arg0: i32) -> (i32, i32) {
    %c0_i32 = arith.constant 0 : i32
    %c0_i32_0 = arith.constant 0 : i32
    %c0_i32_1 = arith.constant 0 : i32
    return %c0_i32, %c0_i32_0 : i32, i32
  }
  func.func @transform_5(%arg0: i32) -> (i32, i32) {
    %c0_i32 = arith.constant 0 : i32
    %c0_i32_0 = arith.constant 0 : i32
    %c0_i32_1 = arith.constant 0 : i32
    return %c0_i32, %c0_i32_0 : i32, i32
  }
  func.func @transform_6(%arg0: i32) -> (i32, i32) {
    %c0_i32 = arith.constant 0 : i32
    %c0_i32_0 = arith.constant 0 : i32
    %c0_i32_1 = arith.constant 0 : i32
    return %c0_i32, %c0_i32_0 : i32, i32
  }
  func.func @transform_7(%arg0: i32) -> (i32, i32) {
    %c0_i32 = arith.constant 0 : i32
    %c0_i32_0 = arith.constant 0 : i32
    %c0_i32_1 = arith.constant 0 : i32
    return %c0_i32, %c0_i32_0 : i32, i32
  }
  func.func @transform_8(%arg0: i32) -> (i32, i32) {
    %c0_i32 = arith.constant 0 : i32
    %c0_i32_0 = arith.constant 0 : i32
    %c0_i32_1 = arith.constant 0 : i32
    return %c0_i32, %c0_i32_0 : i32, i32
  }
  func.func @transform_9(%arg0: i32) -> (i32, i32) {
    %c0_i32 = arith.constant 0 : i32
    %c0_i32_0 = arith.constant 0 : i32
    %c0_i32_1 = arith.constant 0 : i32
    return %c0_i32, %c0_i32_0 : i32, i32
  }
  func.func @transform_10(%arg0: i32) -> (i32, i32) {
    %c0_i32 = arith.constant 0 : i32
    %c0_i32_0 = arith.constant 0 : i32
    %c0_i32_1 = arith.constant 0 : i32
    return %c0_i32, %c0_i32_0 : i32, i32
  }
  func.func @transform_11(%arg0: i32) -> (i32, i32) {
    %c0_i32 = arith.constant 0 : i32
    %c0_i32_0 = arith.constant 0 : i32
    return %arg0, %c0_i32 : i32, i32
  }
}

</mosaic_0001>

<bundles_post_ra>
// kernel: tpu_custom_call.1
= control target key start
LH: loop header
LB: loop body
LE: loop exit
PB: predicated region body
PF: predicated region fallthrough
CT: control target
= control target key end

     0   :  { %v1065_v7 = vmov 0.0   ;;  %v1066_v8 = vmov 0   ;;  %s1463_s0 = inlined_call_operand.vmem [shape: f32[1,80,80], index: 0, kind: input, shape index: {}]   ;;  %s1464_s1 = inlined_call_operand.vmem [shape: f32[1,80,1], index: 1, kind: input, shape index: {}]   ;;  %s1465_s2 = inlined_call_operand.vmem [shape: f32[80,192], index: 2, kind: input, shape index: {}]   ;;  %s1466_s3 = inlined_call_operand.vmem [shape: f32[1,192], index: 3, kind: input, shape index: {}]   ;;  %s1467_s4 = inlined_call_operand.vmem [shape: f32[1,192], index: 4, kind: input, shape index: {}]   ;;  %s1468_s5 = inlined_call_operand.vmem [shape: f32[128,64], index: 5, kind: input, shape index: {}]   ;;  %s1469_s6 = inlined_call_operand.vmem [shape: f32[1,64], index: 6, kind: input, shape index: {}]   ;;  %s1470_s7 = inlined_call_operand.vmem [shape: f32[64,8], index: 7, kind: input, shape index: {}]   ;;  %s1471_s8 = inlined_call_operand.vmem [shape: f32[8,64], index: 8, kind: input, shape index: {}]   ;;  %s1472_s9 = inlined_call_operand.vmem [shape: f32[1,64], index: 9, kind: input, shape index: {}]   ;;  %s1473_s10 = inlined_call_operand.vmem [shape: f32[1,64], index: 10, kind: input, shape index: {}]   ;;  %s1474_s11 = inlined_call_operand.hbm [shape: f32[8,64], index: 11, kind: output, shape index: {}]  }
   0x1   :  { %v60_v0 = vld [vmem:[%s1465_s2 + $0x8] sm:$0xff]  ;;  %v62_v1 = vld [vmem:[%s1465_s2 + $0x18] sm:$0xff]  ;;  %v59_v2 = vld [vmem:[%s1465_s2] sm:$0xff]  ;;  %186 = vmatprep.mubr.f32.mxu0 %v1065_v7  ;;  %1037 = vset.pattern.permute.xlu0 %v1066_v8 }
   0x2   :  { %v964_v3 = vpack.c.bf16 %v62_v1, %v60_v0  ;;  %v61_v4 = vld [vmem:[%s1465_s2 + $0x10] sm:$0xff]  ;;  %v64_v5 = vld [vmem:[%s1465_s2 + $0x28] sm:$0xff]  ;;  %v66_v6 = vld [vmem:[%s1465_s2 + $0x38] sm:$0xff]  ;;  %1038 = vset.pattern.permute.xlu1 %v1066_v8 }
   0x3   :  { %v966_v9 = vpack.c.bf16 %v61_v4, %v59_v2  ;;  %v968_v10 = vpack.c.bf16 %v66_v6, %v64_v5  ;;  %v63_v11 = vld [vmem:[%s1465_s2 + $0x20] sm:$0xff]  ;;  %v65_v12 = vld [vmem:[%s1465_s2 + $0x30] sm:$0xff]  ;;  %v68_v13 = vld [vmem:[%s1465_s2 + $0x48] sm:$0xff] }
   0x4   :  { %965 = vmatprep.subr.bf16.mxu0 %v964_v3  ;;  %v70_v14 = vld [vmem:[%s1465_s2 + $0x58] sm:$0xff]  ;;  %v970_v15 = vpack.c.bf16 %v65_v12, %v63_v11  ;;  %v67_v17 = vld [vmem:[%s1465_s2 + $0x40] sm:$0xff]  ;;  %v69_v18 = vld [vmem:[%s1465_s2 + $0x50] sm:$0xff] }
   0x5   :  { %967 = vmatpush1.bf16.msra.mxu0 %v966_v9  ;;  %v972_v16 = vpack.c.bf16 %v70_v14, %v68_v13  ;;  %v72_v19 = vld [vmem:[%s1465_s2 + $0x68] sm:$0xff]  ;;  %v74_v20 = vld [vmem:[%s1465_s2 + $0x78] sm:$0xff]  ;;  %v974_v21 = vpack.c.bf16 %v69_v18, %v67_v17  ;;  %v71_v23 = vld [vmem:[%s1465_s2 + $0x60] sm:$0xff] }
   0x6   :  { %969 = vmatprep.subr.bf16.mxu0 %v968_v10  ;;  %v976_v22 = vpack.c.bf16 %v74_v20, %v72_v19  ;;  %v73_v24 = vld [vmem:[%s1465_s2 + $0x70] sm:$0xff]  ;;  %v76_v25 = vld [vmem:[%s1465_s2 + $0x88] sm:$0xff]  ;;  %v78_v26 = vld [vmem:[%s1465_s2 + $0x98] sm:$0xff] }
   0x7   :  { %v49_v27 = vld [vmem:[%s1464_s1] sm:$0xff]  ;;  %v51_v28 = vld [vmem:[%s1464_s1 + $0x10] sm:$0xff]  ;;  %v978_v29 = vpack.c.bf16 %v73_v24, %v71_v23  ;;  %v50_v30 = vld [vmem:[%s1464_s1 + $0x8] sm:$0xff]  ;;  %v980_v32 = vpack.c.bf16 %v78_v26, %v76_v25 }
   0x8   :  { %301 = vperm.xlu0 %1037, %v49_v27   ;;  %311 = vperm.xlu1 %1038, %v51_v28   ;;  %v52_v31 = vld [vmem:[%s1464_s1 + $0x18] sm:$0xff]  ;;  %v75_v33 = vld [vmem:[%s1465_s2 + $0x80] sm:$0xff]  ;;  %v77_v34 = vld [vmem:[%s1465_s2 + $0x90] sm:$0xff] }
   0x9   :  { %971 = vmatpush1.bf16.msra.mxu0 %v970_v15 }
   0xa   :  { %973 = vmatprep.subr.bf16.mxu0 %v972_v16 }
   0xd   :  { %975 = vmatpush1.bf16.msra.mxu0 %v974_v21 }
   0xe   :  { %977 = vmatprep.subr.bf16.mxu0 %v976_v22 }
   0xf   :  { %16 = vsyncpa [#allocation3], 0  ;;  %306 = vperm.xlu0 %1037, %v50_v30   ;;  %316 = vperm.xlu1 %1038, %v52_v31   ;;  %v982_v35 = vpack.c.bf16 %v77_v34, %v75_v33  ;;  %v53_v36 = vld [vmem:[%s1464_s1 + $0x20] sm:$0xff]  ;;  %v54_v37 = vld [vmem:[%s1464_s1 + $0x28] sm:$0xff]  ;;  %vm91_vm0 = vcmask 654336   ;;  %v1067_v55 = vmov 0.0|0.0   ;;  %v81_v23 = vlaneseq }
  0x10   :  { %v39_v38 = vld [vmem:[%s1463_s0] sm:$0xff]  ;;  %v55_v39 = vld [vmem:[%s1464_s1 + $0x30] sm:$0xff]  ;;  %v56_v40 = vld [vmem:[%s1464_s1 + $0x38] sm:$0xff]  ;;  %984 = vmatprep.subr.bf16.mxu1 %v1067_v55  ;;  %vm1068_vm1 = vmmov 0   ;;  %vm492_vm2 = vcmask 523264   ;;  %vm567_vm3 = vcmask 64512  }
  0x11   :  { %979 = vmatpush1.bf16.msra.mxu0 %v978_v29  ;;  %v40_v41 = vld [vmem:[%s1463_s0 + $0x8] sm:$0xff]  ;;  %v57_v42 = vld [vmem:[%s1464_s1 + $0x40] sm:$0xff]  ;;  %v41_v44 = vld [vmem:[%s1463_s0 + $0x10] sm:$0xff]  ;;  %913 = vmatprep.mubr.msk.f32.mxu1 %vm1068_vm1, %v1065_v7  ;;  %v82_v24 = vshrl.u32 %v81_v23, 7 }
  0x12   :  { %981 = vmatprep.subr.bf16.mxu0 %v980_v32  ;;  %v58_v43 = vld [vmem:[%s1464_s1 + $0x48] sm:$0xff]  ;;  %v42_v45 = vld [vmem:[%s1463_s0 + $0x18] sm:$0xff]  ;;  %v43_v46 = vld [vmem:[%s1463_s0 + $0x20] sm:$0xff]  ;;  %s1069_s1 = smov [#allocation2]  }
  0x13   :  { %321 = vperm.xlu0 %1037, %v53_v36   ;;  %326 = vperm.xlu1 %1038, %v54_v37   ;;  %v44_v47 = vld [vmem:[%s1463_s0 + $0x28] sm:$0xff]  ;;  %v45_v48 = vld [vmem:[%s1463_s0 + $0x30] sm:$0xff]  ;;  %v46_v49 = vld [vmem:[%s1463_s0 + $0x38] sm:$0xff]  ;;  %v83_v25 = vsub.s32 0, %v82_v24  ;;  %v87_v27 = vsub.s32 1, %v82_v24  ;;  %s817_s27 = sshll.u32 %s1069_s1, 4  ;;  %s818_s27 = int_to_ptr.vmem [resolvable:$true] %s817_s27 }
  0x14   :  { %v47_v50 = vld [vmem:[%s1463_s0 + $0x40] sm:$0xff]  ;;  %v48_v51 = vld [vmem:[%s1463_s0 + $0x48] sm:$0xff]  ;;  %v393_v56 = vld [vmem:[%s1468_s5 + $0x10] sm:$0xff]  ;;  %s1041_s28 = scalar_lea.vmem %s818_s27, 128  ;;  %p1046_p1 = scmp.lt.s32.totalorder %s818_s27, %s818_s27 }
  0x15   :  { %983 = vmatpush1.bf16.msra.mxu0 %v982_v35  ;;  %v391_v52 = vld [vmem:[%s1468_s5] sm:$0xff]  ;;  %v392_v53 = vld [vmem:[%s1468_s5 + $0x8] sm:$0xff]  ;;  %v394_v57 = vld [vmem:[%s1468_s5 + $0x18] sm:$0xff]  ;;  %p1042_p0 = scmp.ne.s32.totalorder %s818_s27, %s1041_s28  ;;  %p1047_p2 = scmp.lt.s32.totalorder %s1041_s28, %s1041_s28 }
  0x16   :  { %v985_v54 = vpack.c.bf16 %v392_v53, %v391_v52  ;;  %1020 = vmatprep.subr.bf16.mxu0 %v1067_v55  ;;  %v988_v58 = vpack.c.bf16 %v394_v57, %v393_v56  ;;  %v395_v59 = vld [vmem:[%s1468_s5 + $0x20] sm:$0xff]  ;;  %v396_v60 = vld [vmem:[%s1468_s5 + $0x28] sm:$0xff]  ;;  %v397_v62 = vld [vmem:[%s1468_s5 + $0x30] sm:$0xff] }
  0x17   :  { %331 = vperm.xlu0 %1037, %v55_v39   ;;  %336 = vperm.xlu1 %1038, %v56_v40   ;;  %v991_v61 = vpack.c.bf16 %v396_v60, %v395_v59  ;;  %v398_v63 = vld [vmem:[%s1468_s5 + $0x38] sm:$0xff]  ;;  %v399_v1 = vld [vmem:[%s1468_s5 + $0x40] sm:$0xff]  ;;  %v400_v2 = vld [vmem:[%s1468_s5 + $0x48] sm:$0xff]  ;;  %p1048_p3 = por %p1047_p2, %p1046_p1 }
  0x18   :  { %825 = vmatmul.mubr.msk.f32.vlgmr.msra.gmra.mrb[0].mxu0 %vm91_vm0, %v39_v38  ;;  %986 = vmatpush3.bf16.msra.mxu1 %v985_v54  ;;  %v994_v0 = vpack.c.bf16 %v398_v63, %v397_v62  ;;  %v997_v3 = vpack.c.bf16 %v400_v2, %v399_v1  ;;  %v401_v4 = vld [vmem:[%s1468_s5 + $0x50] sm:$0xff]  ;;  %v402_v5 = vld [vmem:[%s1468_s5 + $0x58] sm:$0xff]  ;;  %v403_v8 = vld [vmem:[%s1468_s5 + $0x60] sm:$0xff] }
  0x19   :  { %192 = vmatprep.mubr.f32.mxu0 %v1065_v7  ;;  %987 = vmatprep.subr.bf16.mxu1 %v1067_v55  ;;  %v1000_v6 = vpack.c.bf16 %v402_v5, %v401_v4  ;;  %v404_v9 = vld [vmem:[%s1468_s5 + $0x68] sm:$0xff]  ;;  %v405_v11 = vld [vmem:[%s1468_s5 + $0x70] sm:$0xff]  ;;  %v406_v12 = vld [vmem:[%s1468_s5 + $0x78] sm:$0xff]  ;;  %p1049_p4 = pnand %p1048_p3, %p1042_p0 }
  0x1a   :  { %v1003_v10 = vpack.c.bf16 %v404_v9, %v403_v8  ;;  %v1006_v13 = vpack.c.bf16 %v406_v12, %v405_v11  ;;  %v484_v14 = vld [vmem:[%s1470_s7] sm:$0xff]  ;;  %v485_v15 = vld [vmem:[%s1470_s7 + $0x8] sm:$0xff]  ;;  %v486_v17 = vld [vmem:[%s1470_s7 + $0x10] sm:$0xff] }
  0x1b   :  { %341 = vperm.xlu0 %1037, %v57_v42   ;;  %346 = vperm.xlu1 %1038, %v58_v43   ;;  %v1338_v16 = vpack.c.bf16 %v485_v15, %v484_v14  ;;  %v487_v18 = vld [vmem:[%s1470_s7 + $0x18] sm:$0xff]  ;;  %v488_v20 = vld [vmem:[%s1470_s7 + $0x20] sm:$0xff]  ;;  %v489_v21 = vld [vmem:[%s1470_s7 + $0x28] sm:$0xff] }
  0x1c   :  { %826 = vmatmul.mubr.msk.f32.gmra.mrb[2].mxu0 %vm91_vm0, %v40_v41  ;;  %989 = vmatpush3.bf16.msra.mxu1 %v988_v58  ;;  %v1348_v19 = vpack.c.bf16 %v487_v18, %v486_v17  ;;  %v1358_v22 = vpack.c.bf16 %v489_v21, %v488_v20  ;;  %v79_v26 = vld [vmem:[%s1466_s3] sm:$0x3] }
  0x1d   :  { %198 = vmatprep.mubr.f32.mxu0 %v1065_v7  ;;  %990 = vmatprep.subr.bf16.mxu1 %v1067_v55  ;;  %v247_v28 = vld [vmem:[%s1467_s4] sm:$0x3]  ;;  %v1368_v29 = vrot.slane %v79_v26, %v83_v25  ;;  %v1370_v30 = vrot.slane %v79_v26, %v87_v27 }
  0x1e   :  { %1022 = vmatpush3.bf16.msra.mxu0 %v1338_v16  ;;  %v1372_v31 = vrot.slane %v247_v28, %v83_v25  ;;  %v1374_v33 = vrot.slane %v247_v28, %v87_v27 }
  0x1f   :  { %1023 = vmatprep.subr.bf16.mxu0 %v1067_v55 }
  0x20   :  { %827 = vmatmul.mubr.msk.f32.gmra.mrb[4].mxu0 %vm91_vm0, %v41_v44  ;;  %992 = vmatpush3.bf16.msra.mxu1 %v991_v61 }
  0x21   :  { %204 = vmatprep.mubr.f32.mxu0 %v1065_v7  ;;  %993 = vmatprep.subr.bf16.mxu1 %v1067_v55 }
  0x22   :  { %1025 = vmatpush3.bf16.msra.mxu0 %v1348_v19 }
  0x23   :  { %1026 = vmatprep.subr.bf16.mxu0 %v1067_v55 }
  0x24   :  { %828 = vmatmul.mubr.msk.f32.gmra.mrb[6].mxu0 %vm91_vm0, %v42_v45  ;;  %995 = vmatpush3.bf16.msra.mxu1 %v994_v0 }
  0x25   :  { %210 = vmatprep.mubr.f32.mxu0 %v1065_v7  ;;  %996 = vmatprep.subr.bf16.mxu1 %v1067_v55 }
  0x26   :  { %1028 = vmatpush3.bf16.msra.mxu0 %v1358_v22 }
  0x27   :  { %1029 = vmatprep.subr.bf16.mxu0 %v1067_v55 }
  0x28   :  { %829 = vmatmul.mubr.msk.f32.gmra.mrb[8].mxu0 %vm91_vm0, %v43_v46  ;;  %998 = vmatpush3.bf16.msra.mxu1 %v997_v3 }
  0x29   :  { %216 = vmatprep.mubr.f32.mxu0 %v1065_v7  ;;  %999 = vmatprep.subr.bf16.mxu1 %v1067_v55 }
  0x2c   :  { %830 = vmatmul.mubr.msk.f32.gmra.mrb[10].mxu0 %vm91_vm0, %v44_v47  ;;  %1001 = vmatpush3.bf16.msra.mxu1 %v1000_v6 }
  0x2d   :  { %222 = vmatprep.mubr.f32.mxu0 %v1065_v7  ;;  %1002 = vmatprep.subr.bf16.mxu1 %v1067_v55 }
  0x30   :  { %831 = vmatmul.mubr.msk.f32.gmra.mrb[12].mxu0 %vm91_vm0, %v45_v48  ;;  %1004 = vmatpush3.bf16.msra.mxu1 %v1003_v10 }
  0x31   :  { %228 = vmatprep.mubr.f32.mxu0 %v1065_v7  ;;  %1005 = vmatprep.subr.bf16.mxu1 %v1067_v55 }
  0x34   :  { %832 = vmatmul.mubr.msk.f32.gmra.mrb[14].mxu0 %vm91_vm0, %v46_v49  ;;  %1007 = vmatpush3.bf16.msra.mxu1 %v1006_v13 }
  0x35   :  { %234 = vmatprep.mubr.f32.mxu0 %v1065_v7  ;;  %1008 = vmatprep.subr.bf16.mxu1 %v1067_v55 }
  0x38   :  { %833 = vmatmul.mubr.msk.f32.gmra.mrb[16].mxu0 %vm91_vm0, %v47_v50 }
  0x39   :  { %240 = vmatprep.mubr.f32.mxu0 %v1065_v7 }
  0x3c   :  { %834 = vmatmul.mubr.msk.f32.gmra.mrb[18].mxu0 %vm91_vm0, %v48_v51 }
  0x3d   :  { %956 = vmatprep.mubr.msk.f32.mxu0 %vm1068_vm1, %v1065_v7 }
  0x87   :  { %v302_v37 = vpop.permute.xlu0 %301  ;;  %v312_v61 = vpop.permute.xlu1 %311 }
  0x8e   :  { %v307_v49 = vpop.permute.xlu0 %306  ;;  %v317_v20 = vpop.permute.xlu1 %316 }
  0xeb   :  { %v188_v32 = vpop.f32.mrb[0].mxu0 }
  0xec   :  { %v189_v34 = vadd.f32 %v188_v32, %v1368_v29  ;;  %v190_v35 = vpop.f32.mrb[1].mxu0 }
  0xed   :  { %v191_v36 = vadd.f32 %v190_v35, %v1370_v30 }
  0xee   :  { %v259_v38 = vmul.f32 %v1372_v31, %v189_v34 }
  0xef   :  { %v260_v39 = vmul.f32 %v1374_v33, %v191_v36  ;;  %v194_v40 = vpop.f32.mrb[2].mxu0 }
  0xf0   :  { %v195_v41 = vadd.f32 %v194_v40, %v1368_v29  ;;  %v196_v42 = vpop.f32.mrb[3].mxu0  ;;  %v279_v45 = vmax.f32 %v189_v34, %v259_v38  ;;  %v322_v38 = vpop.permute.xlu0 %321 }
  0xf1   :  { %v280_v43 = vmax.f32 %v191_v36, %v260_v39  ;;  %v197_v44 = vadd.f32 %v196_v42, %v1370_v30 }
  0xf2   :  { %v261_v46 = vmul.f32 %v1372_v31, %v195_v41  ;;  %v349_v56 = vmul.f32 %v302_v37, %v279_v45 }
  0xf3   :  { %v262_v47 = vmul.f32 %v1374_v33, %v197_v44  ;;  %v200_v48 = vpop.f32.mrb[4].mxu0  ;;  %v350_v59 = vmul.f32 %v302_v37, %v280_v43 }
  0xf4   :  { %v281_v50 = vmax.f32 %v195_v41, %v261_v46  ;;  %v201_v51 = vadd.f32 %v200_v48, %v1368_v29  ;;  %v202_v52 = vpop.f32.mrb[5].mxu0 }
  0xf5   :  { %v282_v53 = vmax.f32 %v197_v44, %v262_v47  ;;  %v203_v54 = vadd.f32 %v202_v52, %v1370_v30 }
  0xf6   :  { %v263_v57 = vmul.f32 %v1372_v31, %v201_v51  ;;  %v351_v58 = vmul.f32 %v307_v49, %v281_v50 }
  0xf7   :  { %v264_v60 = vmul.f32 %v1374_v33, %v203_v54  ;;  %v352_v62 = vmul.f32 %v307_v49, %v282_v53  ;;  %v206_v63 = vpop.f32.mrb[6].mxu0 }
  0xf8   :  { %v283_v0 = vmax.f32 %v201_v51, %v263_v57  ;;  %v369_v1 = vmax.f32 %v349_v56, %v351_v58  ;;  %v207_v2 = vadd.f32 %v206_v63, %v1368_v29  ;;  %v208_v3 = vpop.f32.mrb[7].mxu0  ;;  %v327_v51 = vpop.permute.xlu1 %326 }
  0xf9   :  { %v284_v4 = vmax.f32 %v203_v54, %v264_v60  ;;  %v370_v5 = vmax.f32 %v350_v59, %v352_v62  ;;  %v209_v6 = vadd.f32 %v208_v3, %v1370_v30 }
  0xfa   :  { %v353_v8 = vmul.f32 %v312_v61, %v283_v0  ;;  %v265_v9 = vmul.f32 %v1372_v31, %v207_v2  ;;  %v332_v0 = vpop.permute.xlu0 %331 }
  0xfb   :  { %v354_v10 = vmul.f32 %v312_v61, %v284_v4  ;;  %v266_v11 = vmul.f32 %v1374_v33, %v209_v6  ;;  %v212_v12 = vpop.f32.mrb[8].mxu0 }
  0xfc   :  { %v285_v13 = vmax.f32 %v207_v2, %v265_v9  ;;  %v371_v14 = vmax.f32 %v369_v1, %v353_v8  ;;  %v213_v15 = vadd.f32 %v212_v12, %v1368_v29  ;;  %v214_v17 = vpop.f32.mrb[9].mxu0 }
  0xfd   :  { %v286_v18 = vmax.f32 %v209_v6, %v266_v11  ;;  %v372_v21 = vmax.f32 %v370_v5, %v354_v10  ;;  %v215_v23 = vadd.f32 %v214_v17, %v1370_v30 }
  0xfe   :  { %v355_v24 = vmul.f32 %v317_v20, %v285_v13  ;;  %v267_v25 = vmul.f32 %v1372_v31, %v213_v15 }
  0xff   :  { %v356_v26 = vmul.f32 %v317_v20, %v286_v18  ;;  %v268_v27 = vmul.f32 %v1374_v33, %v215_v23  ;;  %v218_v28 = vpop.f32.mrb[10].mxu0 }
 0x100   :  { %v373_v32 = vmax.f32 %v371_v14, %v355_v24  ;;  %v287_v34 = vmax.f32 %v213_v15, %v267_v25  ;;  %v219_v35 = vadd.f32 %v218_v28, %v1368_v29  ;;  %v220_v36 = vpop.f32.mrb[11].mxu0  ;;  %v337_v14 = vpop.permute.xlu1 %336 }
 0x101   :  { %v374_v37 = vmax.f32 %v372_v21, %v356_v26  ;;  %v288_v39 = vmax.f32 %v215_v23, %v268_v27  ;;  %v221_v40 = vadd.f32 %v220_v36, %v1370_v30 }
 0x102   :  { %v357_v41 = vmul.f32 %v322_v38, %v287_v34  ;;  %v269_v42 = vmul.f32 %v1372_v31, %v219_v35  ;;  %v342_v34 = vpop.permute.xlu0 %341 }
 0x103   :  { %v358_v43 = vmul.f32 %v322_v38, %v288_v39  ;;  %v270_v44 = vmul.f32 %v1374_v33, %v221_v40  ;;  %v224_v45 = vpop.f32.mrb[12].mxu0 }
 0x104   :  { %v375_v46 = vmax.f32 %v373_v32, %v357_v41  ;;  %v289_v47 = vmax.f32 %v219_v35, %v269_v42  ;;  %v225_v48 = vadd.f32 %v224_v45, %v1368_v29  ;;  %v226_v49 = vpop.f32.mrb[13].mxu0 }
 0x105   :  { %v376_v50 = vmax.f32 %v374_v37, %v358_v43  ;;  %v290_v52 = vmax.f32 %v221_v40, %v270_v44  ;;  %v227_v53 = vadd.f32 %v226_v49, %v1370_v30  ;;  %v347_v44 = vpop.permute.xlu1 %346 }
 0x106   :  { %v359_v54 = vmul.f32 %v327_v51, %v289_v47  ;;  %v271_v56 = vmul.f32 %v1372_v31, %v225_v48 }
 0x107   :  { %v360_v57 = vmul.f32 %v327_v51, %v290_v52  ;;  %v272_v58 = vmul.f32 %v1374_v33, %v227_v53  ;;  %v230_v59 = vpop.f32.mrb[14].mxu0  ;;  %v566_v52 = vld [vmem:[%s1471_s8] sm:$0xff] }
 0x108   :  { %v377_v60 = vmax.f32 %v375_v46, %v359_v54  ;;  %v291_v61 = vmax.f32 %v225_v48, %v271_v56  ;;  %v231_v62 = vadd.f32 %v230_v59, %v1368_v29  ;;  %v232_v63 = vpop.f32.mrb[15].mxu0 }
 0x109   :  { %v378_v1 = vmax.f32 %v376_v50, %v360_v57  ;;  %v292_v2 = vmax.f32 %v227_v53, %v272_v58  ;;  %v233_v3 = vadd.f32 %v232_v63, %v1370_v30 }
 0x10a   :  { %v361_v4 = vmul.f32 %v332_v0, %v291_v61  ;;  %v273_v5 = vmul.f32 %v1372_v31, %v231_v62 }
 0x10b   :  { %v362_v6 = vmul.f32 %v332_v0, %v292_v2  ;;  %v274_v8 = vmul.f32 %v1374_v33, %v233_v3  ;;  %v236_v9 = vpop.f32.mrb[16].mxu0  ;;  %v840_v2 = vld [vmem:[%s1472_s9] ss:$0 sm:$0xff] }
 0x10c   :  { %v379_v10 = vmax.f32 %v377_v60, %v361_v4  ;;  %v293_v11 = vmax.f32 %v231_v62, %v273_v5  ;;  %v237_v12 = vadd.f32 %v236_v9, %v1368_v29  ;;  %v238_v13 = vpop.f32.mrb[17].mxu0  ;;  %v841_v4 = vld [vmem:[%s1473_s10] ss:$0 sm:$0xff] }
 0x10d   :  { %v380_v15 = vmax.f32 %v378_v1, %v362_v6  ;;  %v294_v17 = vmax.f32 %v233_v3, %v274_v8  ;;  %v239_v18 = vadd.f32 %v238_v13, %v1370_v30 }
 0x10e   :  { %v363_v20 = vmul.f32 %v337_v14, %v293_v11  ;;  %v275_v21 = vmul.f32 %v1372_v31, %v237_v12 }
 0x10f   :  { %v364_v23 = vmul.f32 %v337_v14, %v294_v17  ;;  %v276_v24 = vmul.f32 %v1374_v33, %v239_v18  ;;  %v242_v25 = vpop.f32.mrb[18].mxu0 }
 0x110   :  { %v381_v26 = vmax.f32 %v379_v10, %v363_v20  ;;  %v295_v27 = vmax.f32 %v237_v12, %v275_v21  ;;  %v243_v28 = vadd.f32 %v242_v25, %v1368_v29  ;;  %v244_v32 = vpop.f32.mrb[19].mxu0 }
 0x111   :  { %v382_v35 = vmax.f32 %v380_v15, %v364_v23  ;;  %v296_v36 = vmax.f32 %v239_v18, %v276_v24  ;;  %v245_v37 = vadd.f32 %v244_v32, %v1370_v30  ;;  %v490_v30 = vld [vmem:[%s1470_s7 + $0x30] sm:$0xff] }
 0x112   :  { %v365_v38 = vmul.f32 %v342_v34, %v295_v27  ;;  %v277_v39 = vmul.f32 %v1372_v31, %v243_v28 }
 0x113   :  { %v366_v40 = vmul.f32 %v342_v34, %v296_v36  ;;  %v278_v41 = vmul.f32 %v1374_v33, %v245_v37 }
 0x114   :  { %v383_v42 = vmax.f32 %v381_v26, %v365_v38  ;;  %v297_v43 = vmax.f32 %v243_v28, %v277_v39 }
 0x115   :  { %v384_v45 = vmax.f32 %v382_v35, %v366_v40  ;;  %v298_v46 = vmax.f32 %v245_v37, %v278_v41 }
 0x116   :  { %v367_v47 = vmul.f32 %v347_v44, %v297_v43 }
 0x117   :  { %v368_v48 = vmul.f32 %v347_v44, %v298_v46 }
 0x118   :  { %v385_v29 = vmax.f32 %v383_v42, %v367_v47 }
 0x119   :  { %v386_v49 = vmax.f32 %v384_v45, %v368_v48 }
 0x11a   :  { %v387_v50 = vmul.f32 0.01, %v385_v29 }
 0x11b   :  { %v388_v3 = vmul.f32 0.01, %v386_v49 }
 0x11c   :  { %v389_v51 = vmax.f32 %v385_v29, %v387_v50 }
 0x11d   :  { %v390_v6 = vmax.f32 %v386_v49, %v388_v3 }
 0x11e   :  { %914 = vmatmul.mubr.f32.vlgmr.msra.gmra.mrb[0].mxu1 %v389_v51 }
 0x11f   :  { %1010 = vmatpush3.bf16.msra.mxu1 %v1338_v16  ;;  %932 = vmatprep.mubr.msk.f32.mxu1 %vm1068_vm1, %v1065_v7  ;;  %v491_v16 = vld [vmem:[%s1470_s7 + $0x38] sm:$0xff] }
 0x120   :  { %1011 = vmatprep.subr.bf16.mxu1 %v1067_v55  ;;  %v1018_v31 = vpack.c.bf16 %v491_v16, %v490_v30 }
 0x122   :  { %1031 = vmatpush3.bf16.msra.mxu0 %v1018_v31 }
 0x123   :  { %1013 = vmatpush3.bf16.msra.mxu1 %v1348_v19  ;;  %v835_v19 = vld [vmem:[%s1469_s6] ss:$0 sm:$0xff] }
 0x124   :  { %1014 = vmatprep.subr.bf16.mxu1 %v1067_v55 }
 0x127   :  { %1016 = vmatpush3.bf16.msra.mxu1 %v1358_v22 }
 0x128   :  { %1017 = vmatprep.subr.bf16.mxu1 %v1067_v55 }
 0x12b   :  { %1019 = vmatpush3.bf16.msra.mxu1 %v1018_v31 }
 0x12c   :  { %935 = vmatprep.subr.mxu1 %v1065_v7 }
 0x1f1   :  { %v480_v22 = vpop.f32.mrb[0].mxu1 }
 0x1f2   :  { %v481_v55 = vadd.f32 %v835_v19, %v480_v22  ;;  %v915_v33 = vpop.f32.mrb[1].mxu1 }
 0x1f4   :  { %933 = vmatmul.mubr.msk.f32.vlgmr.msra.gmra.mrb[2].mxu1 %vm492_vm2, %v481_v55 }
 0x1f5   :  { %936 = vmatpush3.msra.mxu1 %v566_v52  ;;  %937 = vmatprep.mubr.msk.f32.mxu1 %vm1068_vm1, %v1065_v7 }
 0x1f6   :  { %959 = vmatprep.subr.mxu1 %v1065_v7 }
 0x2c7   :  { %v562_v53 = vpop.f32.mrb[2].mxu1 }
 0x2c8   :  { %v934_v54 = vpop.f32.mrb[3].mxu1  ;;  %938 = vmatmul.mubr.msk.f32.vlgmr.msra.gmra.mrb[4].mxu1 %vm567_vm3, %v562_v53 }
 0x2c9   :  { %960 = vmatpush3.msra.mxu1 %v566_v52  ;;  %961 = vmatprep.mubr.msk.f32.mxu1 %vm1068_vm1, %v1065_v7 }
 0x39b   :  { %v637_v56 = vpop.f32.mrb[4].mxu1 }
 0x39c   :  { %v641_v57 = vsub.f32 %v481_v55, %v637_v56  ;;  %v939_v58 = vpop.f32.mrb[5].mxu1 }
 0x39e   :  { %v642_v59 = vmul.f32 %v641_v57, %v641_v57 }
 0x3a0   :  { %957 = vmatmul.mubr.msk.f32.vlgmr.msra.gmra.mrb[20].mxu0 %vm492_vm2, %v642_v59 }
 0x473   :  { %v712_v60 = vpop.f32.mrb[20].mxu0 }
 0x474   :  { %v958_v61 = vpop.f32.mrb[21].mxu0  ;;  %962 = vmatmul.mubr.msk.f32.vlgmr.msra.gmra.mrb[6].mxu1 %vm567_vm3, %v712_v60 }
 0x547   :  { %v785_v62 = vpop.f32.mrb[6].mxu1 }
 0x548   :  { %v786_v63 = vadd.f32 1e-05, %v785_v62  ;;  %v963_v0 = vpop.f32.mrb[7].mxu1 }
 0x54a   :  { %1039 = vrsqrt.f32 %v786_v63 }
 0x554   :  { %v1040_v1 = vpop.eup %1039 }
 0x555   :  { %v790_v7 = vmul.f32 %v1040_v1, %v641_v57 }
 0x557   :  { %v798_v5 = vmul.f32 %v840_v2, %v790_v7 }
 0x559   :  { %v806_v8 = vadd.f32 %v841_v4, %v798_v5 }
 0x55b   :  { %v807_v9 = vadd.f32 %v806_v8, %v390_v6 }
 0x55d   :  { %v808_v10 = vmul.f32 0.01, %v807_v9 }
 0x55f   :  { %v809_v11 = vmax.f32 %v807_v9, %v808_v10 }
 0x561   :  { %810 = vst.msk [vmem:[#allocation2] sm:$0xff] %vm492_vm2, %v809_v11 }
 0x562   :  { %1052 = shalt.err (!%p1049_p4)
}
 0x563   :  { %s1053_s29 = scalar_lea.hbm %s1474_s11, 128 }
 0x564   :  { %p1054_p5 = scmp.ne.s32.totalorder %s1474_s11, %s1053_s29  ;;  %p1057_p6 = scmp.lt.u32.totalorder %s1053_s29, %s1474_s11 }
 0x566   :  { %p1059_p7 = pnand %p1057_p6, %p1054_p5 }
 0x568   :  { %1062 = shalt.err (!%p1059_p7)
}
 0x569   :  { %820 = dma.vmem_to_hbm [thread:$0]  %s818_s27, 128, %s1474_s11, [#allocation3]  }
 0x56a   :  { %1063 = dma.done.wait [#allocation3], 128  }
 0x56b   :  { %1064 = vsyncadd [#allocation3], 4294967168 }
 0x56c   :  { %824 = vsyncpa [#allocation3], 1 }

</bundles_post_ra>
